<compile_context>
chip_gen: v7x
topology: tpu7x:2x2x1
jax: 0.10.0
libtpu: 0.0.40
codegen_flags: <defaults>
</compile_context>

<pallas_src>
import functools

import jax
import jax.numpy as jnp
from jax.experimental import pallas as pl
from jax.experimental.pallas import tpu as pltpu

LANE = 128                      # feature dims padded to multiples of this
F32 = jnp.float32
_MIB = 1024 * 1024


def _round_up(x, m):
    return (x + m - 1) // m * m


def _itemsize(dtype):
    return jnp.dtype(dtype).itemsize


def _vmem_capacity_bytes():
    try:
        return int(pltpu.get_tpu_info().vmem_capacity_bytes)
    except Exception:
        return 64 * _MIB        # conservative (v7x) if the query is unavailable


# --------------------------------------------------------------------------- #
# Kernel: whole (chunk of the) FFN stack on one row tile.
# --------------------------------------------------------------------------- #
def _ffn_kernel(*refs, num_layers, compute_dtype):
    # refs = (x, w0, b0, w1, b1, ..., out); one grid step = one row tile.
    x_ref = refs[0]
    o_ref = refs[1 + 2 * num_layers]

    h = x_ref[...]
    for l in range(num_layers):
        w_ref = refs[1 + 2 * l]            # [d_in_p, d_out_p] (pre-transposed)
        b_ref = refs[2 + 2 * l]            # [1, d_out_p] (f32)
        y = jnp.dot(h.astype(compute_dtype), w_ref[...],
                    preferred_element_type=jnp.float32)
        y = y + b_ref[...].astype(jnp.float32)   # bias broadcast over rows
        h = jnp.maximum(y, 0.0)                  # ReLU in f32 (VPU filler)
        # Dropout: eval-mode identity (no mask, no 1/(1-p) scaling).
    o_ref[...] = h.astype(o_ref.dtype)


# --------------------------------------------------------------------------- #
# VMEM accounting helpers.
# --------------------------------------------------------------------------- #
def _chunk_vmem_bytes(layer_params, tm, x_dtype, out_dtype, weight_bufs):
    """Rough resident-VMEM footprint of one fused chunk at row tile `tm`."""
    d_in = layer_params[0][0].shape[0]
    d_out = layer_params[-1][0].shape[1]
    total = 0
    max_d = d_in
    for (w_t, b2d) in layer_params:
        total += w_t.size * _itemsize(w_t.dtype) * weight_bufs
        total += 8 * b2d.shape[1] * _itemsize(b2d.dtype) * weight_bufs  # (1,d)->(8,d)
        max_d = max(max_d, w_t.shape[1])
    total += 2 * tm * d_in * _itemsize(x_dtype)       # double-buffered x tile
    total += 2 * tm * d_out * _itemsize(out_dtype)    # double-buffered out tile
    total += 2 * tm * max_d * 4                       # f32 activation temporaries
    return total


# --------------------------------------------------------------------------- #
# One fused pallas_call over a chunk of consecutive layers.
# --------------------------------------------------------------------------- #
def _fused_chunk_call(x2d, layer_params, *, out_dtype, tm,
                      single_buffer_weights, vmem_limit_bytes):
    M, D_in = x2d.shape
    num_layers = len(layer_params)
    D_out = layer_params[-1][0].shape[1]
    compute_dtype = layer_params[0][0].dtype
    grid = (M // tm,)

    def const_spec(shape):
        # Constant index_map -> stays resident across the M grid.  Request
        # single-buffering so the resident params don't eat 2x VMEM.
        if single_buffer_weights:
            return pl.BlockSpec(shape, lambda *_: (0,) * len(shape),
                                pipeline_mode=pl.Buffered(1))
        return pl.BlockSpec(shape, lambda *_: (0,) * len(shape))

    in_specs = [pl.BlockSpec((tm, D_in), lambda i: (i, 0))]
    args = [x2d]
    flops = 0
    bytes_accessed = (M * D_in * _itemsize(x2d.dtype)
                      + M * D_out * _itemsize(out_dtype))
    for (w_t, b2d) in layer_params:
        d_in, d_out = w_t.shape
        in_specs.append(const_spec((d_in, d_out)))
        in_specs.append(const_spec((1, d_out)))
        args.append(w_t)
        args.append(b2d)
        flops += 2 * M * d_in * d_out
        bytes_accessed += (w_t.size * _itemsize(w_t.dtype)
                           + b2d.size * _itemsize(b2d.dtype))

    kernel = functools.partial(_ffn_kernel, num_layers=num_layers,
                               compute_dtype=compute_dtype)

    return pl.pallas_call(
        kernel,
        out_shape=jax.ShapeDtypeStruct((M, D_out), out_dtype),
        grid=grid,
        in_specs=in_specs,
        out_specs=pl.BlockSpec((tm, D_out), lambda i: (i, 0)),
        compiler_params=pltpu.CompilerParams(
            # M axis is independent -> shard across v7x's 2 TCs; no-op v5e/v6e.
            dimension_semantics=("parallel",),
            vmem_limit_bytes=int(vmem_limit_bytes),
        ),
        cost_estimate=pl.CostEstimate(flops=flops, transcendentals=0,
                                      bytes_accessed=bytes_accessed),
    )(*args)


# --------------------------------------------------------------------------- #
# Driver: tm selection, layer chunking, padding, fallback handling.
# --------------------------------------------------------------------------- #
def feed_forward_fused(x2d, params, dim_output, *, out_dtype=None):
    """Run the whole FFN stack.  `params` are pre-transposed and lane-padded:
       list of (w_t [d_in_p, d_out_p], b [1, d_out_p]).  Returns [M, dim_output].
    """
    out_dtype = out_dtype if out_dtype is not None else x2d.dtype
    if not params:
        return x2d.astype(out_dtype)

    M, D_raw = x2d.shape
    D_in_p = params[0][0].shape[0]
    compute_dtype = params[0][0].dtype

    # Row-tile selection: 8-row sublane alignment for 4-byte tiles, 16 for
    # packed (sub-32-bit) x/out tiles.
    row_align = 8 if min(_itemsize(x2d.dtype), _itemsize(out_dtype)) >= 4 else 16
    vmem_cap = _vmem_capacity_bytes()
    budget = int(vmem_cap * 0.7)
    # Larger row tiles on 128-MiB parts (v5e/v6e); smaller cap on v7x (64 MiB).
    tm_cap = 512 if vmem_cap >= 96 * _MIB else 256
    # >= 2 grid steps whenever M allows so "parallel" can use both v7x cores.
    tm = max(row_align, min(tm_cap, _round_up(-(-M // 2), row_align)))

    def worst_single_layer(tm_):
        return max(_chunk_vmem_bytes([lp], tm_, x2d.dtype, out_dtype, 1)
                   for lp in params)

    while tm > row_align and worst_single_layer(tm) > budget:
        tm = max(row_align, _round_up(tm // 2, row_align))
    # TODO(synk): if a single layer still exceeds the budget at tm==row_align,
    # its weight should be streamed over K (pltpu.emit_pipeline) instead of held
    # resident; not needed for the sizes exercised here.

    M_pad = _round_up(M, tm)
    x_p = x2d
    if M_pad != M or D_in_p != D_raw:
        x_p = jnp.pad(x2d, ((0, M_pad - M), (0, D_in_p - D_raw)))

    # Greedily group consecutive layers into chunks whose resident weights fit.
    chunks, cur = [], []
    for lp in params:
        trial = cur + [lp]
        if cur and _chunk_vmem_bytes(trial, tm, x_p.dtype, out_dtype, 1) > budget:
            chunks.append(cur)
            cur = [lp]
        else:
            cur = trial
    chunks.append(cur)

    max_chunk = max(_chunk_vmem_bytes(c, tm, x_p.dtype, out_dtype, 1)
                    for c in chunks)
    vmem_limit = int(min(0.92 * vmem_cap, max(32 * _MIB, 1.5 * max_chunk)))

    def run(single_buffer_weights):
        h = x_p
        for ci, chunk in enumerate(chunks):
            chunk_out_dtype = out_dtype if ci == len(chunks) - 1 else compute_dtype
            h = _fused_chunk_call(
                h, chunk, out_dtype=chunk_out_dtype, tm=tm,
                single_buffer_weights=single_buffer_weights,
                vmem_limit_bytes=vmem_limit)
        return jax.block_until_ready(h)

    try:
        out = run(True)
    except Exception:
        # pipeline_mode=pl.Buffered(1) unavailable on this jax/libtpu combo:
        # retry with default (double-buffered) specs for the resident params.
        out = run(False)
    return out[:M, :dim_output]


# --------------------------------------------------------------------------- #
# Module wrapper mirroring the PyTorch FeedForward.
# --------------------------------------------------------------------------- #
class FeedForwardPallas:
    """For each dim in config['ffnn_dims']:
       Linear(prev, dim) -> ReLU -> Dropout (eval-mode identity)."""

    def __init__(self, dim_input, config, key, param_dtype=jnp.bfloat16):
        self.dim_input = dim_input
        self.dim_output = dim_input
        self.params = []   # list of (w_t [d_in_p, d_out_p], b [1, d_out_p])
        d_in = dim_input
        for dim in config["ffnn_dims"]:
            key, kw, kb = jax.random.split(key, 3)
            # PyTorch nn.Linear init: U(-1/sqrt(fan_in), 1/sqrt(fan_in))
            bound = 1.0 / (d_in ** 0.5)
            w = jax.random.uniform(kw, (dim, d_in), F32, -bound, bound)
            b = jax.random.uniform(kb, (dim,), F32, -bound, bound)
            # Lane-pad both feature dims to multiples of 128 so every matmul is
            # MXU/lane dense and the final store is an unmasked vst.  Padded
            # rows/cols of W^T and padded bias lanes are zero, so padded lanes
            # stay exactly 0 through bias+ReLU and contribute nothing downstream.
            d_in_p = _round_up(d_in, LANE)
            d_out_p = _round_up(dim, LANE)
            w_t = jnp.zeros((d_in_p, d_out_p), param_dtype)
            w_t = w_t.at[:d_in, :dim].set(w.T.astype(param_dtype))
            b_p = jnp.zeros((1, d_out_p), F32).at[0, :dim].set(b)
            self.params.append((w_t, b_p))
            d_in = dim
            self.dim_output = dim
        self.dropout = config["ffnn_dropout"]
        # TODO(synk): training-mode dropout (pltpu.prng_seed + prng_random_bits
        # mask with 1/(1-p) scaling) is not implemented; eval-mode identity only.

    def __call__(self, x):
        lead = x.shape[:-1]
        h = x.reshape(-1, x.shape[-1])
        out = feed_forward_fused(h, self.params, self.dim_output,
                                 out_dtype=x.dtype)
        return out.reshape(*lead, self.dim_output)


if __name__ == "__main__":
    key = jax.random.PRNGKey(0)
    key, kx, kp = jax.random.split(key, 3)

    batch, seq, dim_input = 2, 8, 32
    config = {"ffnn_dims": [64, 32], "ffnn_dropout": 0.1}

    x = jax.random.normal(kx, (batch, seq, dim_input), F32)

    # f32 params: tight correctness check against a plain-JAX reference.
    ffnn = FeedForwardPallas(dim_input, config, kp, param_dtype=F32)
    out = jax.block_until_ready(ffnn(x))

    d_in_p = ffnn.params[0][0].shape[0]
    h = jnp.pad(x.reshape(-1, dim_input), ((0, 0), (0, d_in_p - dim_input)))
    for (w_t, b) in ffnn.params:
        h = jnp.maximum(
            jnp.dot(h.astype(w_t.dtype), w_t, preferred_element_type=F32) + b, 0.0)
    ref = h[:, :ffnn.dim_output].astype(x.dtype).reshape(
        batch, seq, ffnn.dim_output)

    assert out.shape == (batch, seq, config["ffnn_dims"][-1])
    assert jnp.allclose(out, ref, atol=1e-5, rtol=1e-5)

    # Default bf16-weight path (MXU-native, f32 accumulation): loose check.
    ffnn_bf16 = FeedForwardPallas(dim_input, config, kp)   # param_dtype=bf16
    out_bf16 = jax.block_until_ready(ffnn_bf16(x))
    assert out_bf16.shape == out.shape
    assert jnp.allclose(out_bf16.astype(F32), ref, atol=5e-2, rtol=5e-2)

    print("KERNEL_OK")
</pallas_src>

<mosaic_0001>
module attributes {stable_mosaic.version = 11 : i64} {
  func.func @_ffn_kernel(%arg0: i32, %arg1: memref<8x128xf32, #tpu.memory_space<vmem>>, %arg2: memref<128x128xf32, #tpu.memory_space<vmem>>, %arg3: memref<1x128xf32, #tpu.memory_space<vmem>>, %arg4: memref<128x128xf32, #tpu.memory_space<vmem>>, %arg5: memref<1x128xf32, #tpu.memory_space<vmem>>, %arg6: memref<8x128xf32, #tpu.memory_space<vmem>>) attributes {dimension_semantics = [#tpu.dimension_semantics<parallel>], iteration_bounds = array<i64: 2>, scalar_prefetch = 0 : i64, scratch_operands = 0 : i64, tpu.core_type = #tpu.core_type<tc>, window_params = [{transform_indices = @transform_0, window_bounds = array<i64: 8, 128>}, {pipeline_mode = #tpu.pipeline_mode<synchronous>, transform_indices = @transform_1, window_bounds = array<i64: 128, 128>}, {pipeline_mode = #tpu.pipeline_mode<synchronous>, transform_indices = @transform_2, window_bounds = array<i64: 1, 128>}, {pipeline_mode = #tpu.pipeline_mode<synchronous>, transform_indices = @transform_3, window_bounds = array<i64: 128, 128>}, {pipeline_mode = #tpu.pipeline_mode<synchronous>, transform_indices = @transform_4, window_bounds = array<i64: 1, 128>}, {transform_indices = @transform_5, window_bounds = array<i64: 8, 128>}]} {
    %c0 = arith.constant 0 : index
    %c0_0 = arith.constant 0 : index
    %0 = vector.load %arg1[%c0, %c0_0] : memref<8x128xf32, #tpu.memory_space<vmem>>, vector<8x128xf32>
    %c0_1 = arith.constant 0 : index
    %c0_2 = arith.constant 0 : index
    %1 = vector.load %arg2[%c0_1, %c0_2] : memref<128x128xf32, #tpu.memory_space<vmem>>, vector<128x128xf32>
    %cst = arith.constant dense<0.000000e+00> : vector<8x128xf32>
    %2 = tpu.matmul %0, %1, %cst {dimension_numbers = #tpu.dot_dimension_numbers<[1], [0], [0], [1], [0, 0, 1, 1], [], []>} : vector<8x128xf32>, vector<128x128xf32>, vector<8x128xf32> -> vector<8x128xf32>
    %c0_3 = arith.constant 0 : index
    %c0_4 = arith.constant 0 : index
    %3 = vector.load %arg3[%c0_3, %c0_4] : memref<1x128xf32, #tpu.memory_space<vmem>>, vector<1x128xf32>
    %4 = vector.broadcast %3 : vector<1x128xf32> to vector<8x128xf32>
    %5 = arith.addf %2, %4 : vector<8x128xf32>
    %cst_5 = arith.constant 0.000000e+00 : f32
    %6 = vector.broadcast %cst_5 : f32 to vector<8x128xf32>
    %7 = arith.maximumf %5, %6 : vector<8x128xf32>
    %c0_6 = arith.constant 0 : index
    %c0_7 = arith.constant 0 : index
    %8 = vector.load %arg4[%c0_6, %c0_7] : memref<128x128xf32, #tpu.memory_space<vmem>>, vector<128x128xf32>
    %cst_8 = arith.constant dense<0.000000e+00> : vector<8x128xf32>
    %9 = tpu.matmul %7, %8, %cst_8 {dimension_numbers = #tpu.dot_dimension_numbers<[1], [0], [0], [1], [0, 0, 1, 1], [], []>} : vector<8x128xf32>, vector<128x128xf32>, vector<8x128xf32> -> vector<8x128xf32>
    %c0_9 = arith.constant 0 : index
    %c0_10 = arith.constant 0 : index
    %10 = vector.load %arg5[%c0_9, %c0_10] : memref<1x128xf32, #tpu.memory_space<vmem>>, vector<1x128xf32>
    %11 = vector.broadcast %10 : vector<1x128xf32> to vector<8x128xf32>
    %12 = arith.addf %9, %11 : vector<8x128xf32>
    %cst_11 = arith.constant 0.000000e+00 : f32
    %13 = vector.broadcast %cst_11 : f32 to vector<8x128xf32>
    %14 = arith.maximumf %12, %13 : vector<8x128xf32>
    %c0_12 = arith.constant 0 : index
    %c0_13 = arith.constant 0 : index
    %15 = vector.load %arg6[%c0_12, %c0_13] : memref<8x128xf32, #tpu.memory_space<vmem>>, vector<8x128xf32>
    tpu.vector_store %arg6[%c0_12, %c0_13], %14 {strides = array<i32>} : memref<8x128xf32, #tpu.memory_space<vmem>>, vector<8x128xf32>,
    return
  }
  func.func @transform_0(%arg0: i32) -> (i32, i32) {
    %c0_i32 = arith.constant 0 : i32
    %c0_i32_0 = arith.constant 0 : i32
    return %arg0, %c0_i32 : i32, i32
  }
  func.func @transform_1(%arg0: i32) -> (i32, i32) {
    %c0_i32 = arith.constant 0 : i32
    %c0_i32_0 = arith.constant 0 : i32
    %c0_i32_1 = arith.constant 0 : i32
    return %c0_i32, %c0_i32_0 : i32, i32
  }
  func.func @transform_2(%arg0: i32) -> (i32, i32) {
    %c0_i32 = arith.constant 0 : i32
    %c0_i32_0 = arith.constant 0 : i32
    %c0_i32_1 = arith.constant 0 : i32
    return %c0_i32, %c0_i32_0 : i32, i32
  }
  func.func @transform_3(%arg0: i32) -> (i32, i32) {
    %c0_i32 = arith.constant 0 : i32
    %c0_i32_0 = arith.constant 0 : i32
    %c0_i32_1 = arith.constant 0 : i32
    return %c0_i32, %c0_i32_0 : i32, i32
  }
  func.func @transform_4(%arg0: i32) -> (i32, i32) {
    %c0_i32 = arith.constant 0 : i32
    %c0_i32_0 = arith.constant 0 : i32
    %c0_i32_1 = arith.constant 0 : i32
    return %c0_i32, %c0_i32_0 : i32, i32
  }
  func.func @transform_5(%arg0: i32) -> (i32, i32) {
    %c0_i32 = arith.constant 0 : i32
    %c0_i32_0 = arith.constant 0 : i32
    return %arg0, %c0_i32 : i32, i32
  }
}

module attributes {stable_mosaic.version = 11 : i64} {
  func.func @_ffn_kernel(%arg0: i32, %arg1: memref<8x128xf32, #tpu.memory_space<vmem>>, %arg2: memref<128x128xf32, #tpu.memory_space<vmem>>, %arg3: memref<1x128xf32, #tpu.memory_space<vmem>>, %arg4: memref<128x128xf32, #tpu.memory_space<vmem>>, %arg5: memref<1x128xf32, #tpu.memory_space<vmem>>, %arg6: memref<8x128xf32, #tpu.memory_space<vmem>>) attributes {dimension_semantics = [#tpu.dimension_semantics<parallel>], iteration_bounds = array<i64: 2>, scalar_prefetch = 0 : i64, scratch_operands = 0 : i64, tpu.core_type = #tpu.core_type<tc>, window_params = [{transform_indices = @transform_0, window_bounds = array<i64: 8, 128>}, {pipeline_mode = #tpu.pipeline_mode<synchronous>, transform_indices = @transform_1, window_bounds = array<i64: 128, 128>}, {pipeline_mode = #tpu.pipeline_mode<synchronous>, transform_indices = @transform_2, window_bounds = array<i64: 1, 128>}, {pipeline_mode = #tpu.pipeline_mode<synchronous>, transform_indices = @transform_3, window_bounds = array<i64: 128, 128>}, {pipeline_mode = #tpu.pipeline_mode<synchronous>, transform_indices = @transform_4, window_bounds = array<i64: 1, 128>}, {transform_indices = @transform_5, window_bounds = array<i64: 8, 128>}]} {
    %c0 = arith.constant 0 : index
    %c0_0 = arith.constant 0 : index
    %0 = vector.load %arg1[%c0, %c0_0] : memref<8x128xf32, #tpu.memory_space<vmem>>, vector<8x128xf32>
    %c0_1 = arith.constant 0 : index
    %c0_2 = arith.constant 0 : index
    %1 = vector.load %arg2[%c0_1, %c0_2] : memref<128x128xf32, #tpu.memory_space<vmem>>, vector<128x128xf32>
    %cst = arith.constant dense<0.000000e+00> : vector<8x128xf32>
    %2 = tpu.matmul %0, %1, %cst {dimension_numbers = #tpu.dot_dimension_numbers<[1], [0], [0], [1], [0, 0, 1, 1], [], []>} : vector<8x128xf32>, vector<128x128xf32>, vector<8x128xf32> -> vector<8x128xf32>
    %c0_3 = arith.constant 0 : index
    %c0_4 = arith.constant 0 : index
    %3 = vector.load %arg3[%c0_3, %c0_4] : memref<1x128xf32, #tpu.memory_space<vmem>>, vector<1x128xf32>
    %4 = vector.broadcast %3 : vector<1x128xf32> to vector<8x128xf32>
    %5 = arith.addf %2, %4 : vector<8x128xf32>
    %cst_5 = arith.constant 0.000000e+00 : f32
    %6 = vector.broadcast %cst_5 : f32 to vector<8x128xf32>
    %7 = arith.maximumf %5, %6 : vector<8x128xf32>
    %c0_6 = arith.constant 0 : index
    %c0_7 = arith.constant 0 : index
    %8 = vector.load %arg4[%c0_6, %c0_7] : memref<128x128xf32, #tpu.memory_space<vmem>>, vector<128x128xf32>
    %cst_8 = arith.constant dense<0.000000e+00> : vector<8x128xf32>
    %9 = tpu.matmul %7, %8, %cst_8 {dimension_numbers = #tpu.dot_dimension_numbers<[1], [0], [0], [1], [0, 0, 1, 1], [], []>} : vector<8x128xf32>, vector<128x128xf32>, vector<8x128xf32> -> vector<8x128xf32>
    %c0_9 = arith.constant 0 : index
    %c0_10 = arith.constant 0 : index
    %10 = vector.load %arg5[%c0_9, %c0_10] : memref<1x128xf32, #tpu.memory_space<vmem>>, vector<1x128xf32>
    %11 = vector.broadcast %10 : vector<1x128xf32> to vector<8x128xf32>
    %12 = arith.addf %9, %11 : vector<8x128xf32>
    %cst_11 = arith.constant 0.000000e+00 : f32
    %13 = vector.broadcast %cst_11 : f32 to vector<8x128xf32>
    %14 = arith.maximumf %12, %13 : vector<8x128xf32>
    %c0_12 = arith.constant 0 : index
    %c0_13 = arith.constant 0 : index
    %15 = vector.load %arg6[%c0_12, %c0_13] : memref<8x128xf32, #tpu.memory_space<vmem>>, vector<8x128xf32>
    tpu.vector_store %arg6[%c0_12, %c0_13], %14 {strides = array<i32>} : memref<8x128xf32, #tpu.memory_space<vmem>>, vector<8x128xf32>,
    return
  }
  func.func @transform_0(%arg0: i32) -> (i32, i32) {
    %c0_i32 = arith.constant 0 : i32
    %c0_i32_0 = arith.constant 0 : i32
    return %arg0, %c0_i32 : i32, i32
  }
  func.func @transform_1(%arg0: i32) -> (i32, i32) {
    %c0_i32 = arith.constant 0 : i32
    %c0_i32_0 = arith.constant 0 : i32
    %c0_i32_1 = arith.constant 0 : i32
    return %c0_i32, %c0_i32_0 : i32, i32
  }
  func.func @transform_2(%arg0: i32) -> (i32, i32) {
    %c0_i32 = arith.constant 0 : i32
    %c0_i32_0 = arith.constant 0 : i32
    %c0_i32_1 = arith.constant 0 : i32
    return %c0_i32, %c0_i32_0 : i32, i32
  }
  func.func @transform_3(%arg0: i32) -> (i32, i32) {
    %c0_i32 = arith.constant 0 : i32
    %c0_i32_0 = arith.constant 0 : i32
    %c0_i32_1 = arith.constant 0 : i32
    return %c0_i32, %c0_i32_0 : i32, i32
  }
  func.func @transform_4(%arg0: i32) -> (i32, i32) {
    %c0_i32 = arith.constant 0 : i32
    %c0_i32_0 = arith.constant 0 : i32
    %c0_i32_1 = arith.constant 0 : i32
    return %c0_i32, %c0_i32_0 : i32, i32
  }
  func.func @transform_5(%arg0: i32) -> (i32, i32) {
    %c0_i32 = arith.constant 0 : i32
    %c0_i32_0 = arith.constant 0 : i32
    return %arg0, %c0_i32 : i32, i32
  }
}

</mosaic_0001>

<bundles_post_ra>
// kernel: tpu_custom_call.1
= control target key start
LH: loop header
LB: loop body
LE: loop exit
PB: predicated region body
PF: predicated region fallthrough
CT: control target
= control target key end

     0   :  { %10 = vsyncpa [#allocation3], 0  ;;  %s1259_s0 = inlined_call_operand.hbm [shape: f32[16,128], index: 0, kind: input, shape index: {}]   ;;  %s1260_s1 = inlined_call_operand.hbm [shape: f32[128,128], index: 1, kind: input, shape index: {}]   ;;  %s1261_s2 = inlined_call_operand.vmem [shape: f32[1,128], index: 2, kind: input, shape index: {}]   ;;  %s1262_s3 = inlined_call_operand.hbm [shape: f32[128,128], index: 3, kind: input, shape index: {}]   ;;  %s1263_s4 = inlined_call_operand.vmem [shape: f32[1,128], index: 4, kind: input, shape index: {}]   ;;  %s1264_s5 = inlined_call_operand.hbm [shape: f32[16,128], index: 5, kind: output, shape index: {}]  }
   0x1   :  { %12 = vsyncpa [#allocation3 + $0x1], 0 }
   0x2   :  { %13 = vsyncpa [#allocation6], 0 }
   0x3   :  { %14 = vsyncpa [#allocation4], 0 }
   0x4   :  { %16 = vsyncpa [#allocation4 + $0x1], 0  ;;  %s1001_s18 = smov 0   ;;  %s1003_s19 = smov 0  }
   0x5   :  { %s1005_s20 = smov 0   ;;  %s1007_s21 = smov 0  }
   0x6 LB: > { %s1022_s22 = sadd.s32 4294967295, %s960_s21   ;;  %s562_s23 = sadd.s32 4294967294, %s960_s21   ;;  %s960_s21 = sphi %s1007_s21, %s1284_s21   ;;  %s956_s20 = sphi %s1005_s20, %s1283_s20   ;;  %s952_s19 = sphi %s1003_s19, %s1282_s19   ;;  %s948_s18 = sphi %s1001_s18, %s1281_s18  }
   0x7   : > { %p42_p0 = scmp.ne.s32.totalorder %s952_s19, %s948_s18  ;;  %p1265_p1 = scmp.eq.s32.totalorder %s1022_s22, 0 }
   0x8   : > { %p156_p3 = scmp.eq.s32.totalorder %s562_s23, 1  ;;  %p563_p5 = scmp.ge.s32.totalorder %s960_s21, 1 }
   0x9   : > { %p1031_p4 = por %p1265_p1, %p42_p0  ;;  %p163_p7 = scmp.lt.s32.totalorder %s960_s21, 3 }
   0xa   : > { %p1036_p6 = por %p156_p3, %p42_p0  ;;  %s962_s27 = smov [#allocation5]  }
   0xb   : > { %s1268_s24 = scalar_select %p1031_p4, 1, 0 }
   0xc   : > { %s1269_s25 = scalar_select %p1036_p6, 1, 0 }
   0xd   : > { %p1041_p8 = pnand %p563_p5, %p163_p7  ;;  %s175_s28 = sshll.u32 %s962_s27, 4  ;;  %s1045_s28 = int_to_ptr.vmem [resolvable:$true] %s175_s28 }
   0xe   : > { %s963_s30 = smov [#allocation7]   ;;  %s804_s9 = scalar_lea.hbm %s1260_s1, 2048 }
   0xf   : > { %p744_p9 = pneg %p1041_p8  ;;  %s191_s6 = sshll.u32 %s963_s30, 4  ;;  %s1056_s6 = int_to_ptr.vmem [resolvable:$true] %s191_s6 }
  0x10   : > { %p805_p12 = scmp.ne.s32.totalorder %s1260_s1, %s804_s9  ;;  %p811_p5 = scmp.lt.u32.totalorder %s804_s9, %s1260_s1 }
  0x11   : > { %p1052_p11 = pnand %p744_p9, %p1265_p1 }
  0x13   : > { %p806_p13 = pneg %p1052_p11 }
  0x15   : > { %p807_p0 = pnand %p806_p13, %p805_p12 }
  0x17   : > { %p808_p3 = pneg %p807_p0 }
  0x19   : > { %p813_p7 = pnand %p811_p5, %p808_p3 }
  0x1b   : > { %816 = shalt.err (!%p813_p7)
}
  0x1c   : > { %s817_s14 = scalar_lea.vmem %s1045_s28, 2048  ;;  %p825_p2 = scmp.lt.s32.totalorder %s1045_s28, %s1045_s28 }
  0x1d   : > { %p818_p9 = scmp.ne.s32.totalorder %s1045_s28, %s817_s14  ;;  %p826_p12 = scmp.lt.s32.totalorder %s817_s14, %s817_s14 }
  0x1f   : > { %p820_p10 = pnand %p818_p9, %p806_p13  ;;  %p827_p0 = por %p826_p12, %p825_p2 }
  0x21   : > { %p821_p1 = pneg %p820_p10 }
  0x23   : > { %p828_p6 = pnand %p827_p0, %p821_p1 }
  0x25   : > { %831 = shalt.err (!%p828_p6)
}
  0x26   : > { %s964_s15 = smov 128   ;;  %s965_s16 = smov 8  }
  0x27   : > { %747 = dma.hbm_to_vmem [thread:$0]  (!%p1052_p11), %s1260_s1, 2048, %s1045_s28, [#allocation6], %s964_s15, %s964_s15, %s965_s16  }
  0x28   : > { %s832_s7 = scalar_lea.hbm %s1262_s3, 2048 }
  0x29   : > { %p833_p2 = scmp.ne.s32.totalorder %s1262_s3, %s832_s7  ;;  %p839_p10 = scmp.lt.u32.totalorder %s832_s7, %s1262_s3 }
  0x2b   : > { %p835_p1 = pnand %p833_p2, %p806_p13 }
  0x2d   : > { %p836_p6 = pneg %p835_p1 }
  0x2f   : > { %p841_p3 = pnand %p839_p10, %p836_p6 }
  0x31   : > { %844 = shalt.err (!%p841_p3)
}
  0x32   : > { %s845_s28 = scalar_lea.vmem %s1056_s6, 2048  ;;  %p853_p12 = scmp.lt.s32.totalorder %s1056_s6, %s1056_s6 }
  0x33   : > { %p846_p5 = scmp.ne.s32.totalorder %s1056_s6, %s845_s28  ;;  %p854_p0 = scmp.lt.s32.totalorder %s845_s28, %s845_s28 }
  0x35   : > { %p848_p7 = pnand %p846_p5, %p806_p13  ;;  %p855_p2 = por %p854_p0, %p853_p12 }
  0x37   : > { %p849_p9 = pneg %p848_p7 }
  0x39   : > { %p856_p1 = pnand %p855_p2, %p849_p9 }
  0x3b   : > { %859 = shalt.err (!%p856_p1)
}
  0x3c   : > { %750 = dma.hbm_to_vmem [thread:$0]  (!%p1052_p11), %s1262_s3, 2048, %s1056_s6, [#allocation6], %s964_s15, %s964_s15, %s965_s16  }
  0x3d   : > { %s1111_s14 = sadd.s32 1, %s960_s21   ;;  %s29_s29 = sadd.s32 1, %s956_s20 }
  0x3e   : > { %s26_s17 = ssub.s32 %s960_s21, %s1111_s14  ;;  %p36_p13 = scmp.ne.s32.totalorder %s956_s20, %s952_s19 }
  0x3f   : > { %p27_p6 = scmp.eq.s32.totalorder %s26_s17, 0  ;;  %p37_p10 = scmp.eq.s32.totalorder %s960_s21, 0 }
  0x40   : > { %p1272_p3 = scmp.eq.s32.totalorder %s1022_s22, 1  ;;  %p761_p7 = scmp.lt.s32.totalorder %s960_s21, 2 }
  0x41   : > { %s1127_s27 = scalar_select %p27_p6, %s956_s20, %s29_s29  }
  0x42   : > { %p1121_p5 = por %p1272_p3, %p36_p13  ;;  %p38_p9 = por %p37_p10, %p36_p13 }
  0x43   : > { %s208_s30 = sand.u32 1, %s956_s20   ;;  %s568_s6 = sshll.u32 %s960_s21, 7 }
  0x44   : > { %s1273_s23 = scalar_select %p1121_p5, 1, 0 }
  0x45   : > { %s567_s7 = sshll.u32 %s208_s30, 3  ;;  %s1134_s8 = scalar_lea.hbm %s1259_s0, %s568_s6 }
  0x46   : > { %s212_s9 = scalar_lea.vmem [#allocation2], %s567_s7  ;;  %p1138_p11 = pnand %p761_p7, %p38_p9 }
  0x47   : > { %s219_s10 = sshll.u32 %s212_s9, 4  ;;  %s209_s28 = scalar_lea.sflag [#allocation3], %s208_s30  ;;  %s1136_s10 = int_to_ptr.vmem [resolvable:$true] %s219_s10 }
  0x48   : > { %s860_s12 = scalar_lea.hbm %s1134_s8, 128  ;;  %p862_p0 = pneg %p1138_p11 }
  0x49   : > { %p861_p12 = scmp.ne.s32.totalorder %s1134_s8, %s860_s12  ;;  %s865_s17 = scalar_lea.hbm %s1259_s0, 256 }
  0x4a   : > { %p866_p13 = scmp.lt.u32.totalorder %s1134_s8, %s1259_s0  ;;  %p867_p6 = scmp.lt.u32.totalorder %s865_s17, %s860_s12 }
  0x4b   : > { %p863_p2 = pnand %p862_p0, %p861_p12  ;;  %p869_p3 = scmp.lt.u32.totalorder %s860_s12, %s1134_s8 }
  0x4c   : > { %p868_p10 = por %p867_p6, %p866_p13 }
  0x4d   : > { %p864_p1 = pneg %p863_p2 }
  0x4e   : > { %p870_p7 = por %p869_p3, %p868_p10 }
  0x50   : > { %p871_p9 = pnand %p870_p7, %p864_p1 }
  0x52   : > { %874 = shalt.err (!%p871_p9)
}
  0x53   : > { %s875_s30 = scalar_lea.vmem %s1136_s10, 128  ;;  %s966_s15 = smov [#allocation2]  }
  0x54   : > { %p876_p12 = scmp.ne.s32.totalorder %s1136_s10, %s875_s30  ;;  %s880_s16 = sshll.u32 %s966_s15, 4  ;;  %s881_s16 = int_to_ptr.vmem [resolvable:$false] %s880_s16 }
  0x55   : > { %s882_s9 = scalar_lea.vmem %s881_s16, 256  ;;  %p883_p4 = scmp.lt.s32.totalorder %s1136_s10, %s881_s16 }
  0x56   : > { %p878_p2 = pnand %p876_p12, %p862_p0  ;;  %p884_p13 = scmp.lt.s32.totalorder %s882_s9, %s875_s30 }
  0x58   : > { %p879_p5 = pneg %p878_p2  ;;  %p885_p6 = por %p884_p13, %p883_p4 }
  0x5a   : > { %p886_p10 = pnand %p885_p6, %p879_p5 }
  0x5c   : > { %889 = shalt.err (!%p886_p10)
}
  0x5d   : > { %754 = dma.hbm_to_vmem [thread:$0]  (!%p1138_p11), %s1134_s8, 128, %s1136_s10, %s209_s28  }
  0x5e   : > { %228 = sbr.rel (%p1041_p8) target bundleno = 585 (0x249), region = 40  ;;  %s1170_s12 = sand.u32 (!%p1041_p8), 1, %s952_s19  }
  0x5f   : > { %s570_s13 = sshll.u32 (!%p1041_p8), %s1170_s12, 3  ;;  %s231_s29 = scalar_lea.sflag (!%p1041_p8), [#allocation3], %s1170_s12 }
  0x60   : > { %s1176_s17 = scalar_lea.vmem (!%p1041_p8), [#allocation2], %s570_s13  ;;  %p1275_p4 = scmp.ne.s32.totalorder (!%p1041_p8), %s1268_s24, 0 }
  0x65   : > { %935 = dma.done.wait (%p1275_p4), %s231_s29, 128  }
  0x66   : > { %937 = vsyncadd (%p1275_p4), %s231_s29, 4294967168  ;;  %p1276_p5 = scmp.eq.s32.totalorder %s1022_s22, 0 }
  0x68   : > { %939 = dma.done.wait (%p1276_p5), [#allocation6], 4096   ;;  %p1277_p8 = pmov %p1276_p5 }
  0x69   : > { %v967_v0 = vmov 0.0|0.0   ;;  %vm968_vm0 = vmmov 0   ;;  %v969_v1 = vmov 0.0   ;;  %v270_v2 = vld [vmem:[#allocation5] sm:$0xff]  ;;  %v271_v3 = vld [vmem:[#allocation5 + $0x8] sm:$0xff]  ;;  %v272_v4 = vld [vmem:[#allocation5 + $0x10] sm:$0xff] }
  0x6a   : > { %941 = vsyncadd (%p1277_p8), [#allocation6], 4294963200  ;;  %684 = vmatprep.subr.bf16.mxu0 %v967_v0  ;;  %646 = vmatprep.mubr.msk.f32.mxu0 %vm968_vm0, %v969_v1  ;;  %v685_v5 = vpack.c.bf16 %v271_v3, %v270_v2  ;;  %v273_v6 = vld [vmem:[#allocation5 + $0x18] sm:$0xff]  ;;  %v274_v8 = vld [vmem:[#allocation5 + $0x20] sm:$0xff]  ;;  %s577_s11 = sshll.u32 %s1022_s22, 7  ;;  %s268_s28 = scalar_lea.vmem [#allocation8], %s570_s13 }
  0x6b   : > { %708 = vmatprep.subr.bf16.mxu1 %v967_v0  ;;  %681 = vmatprep.mubr.msk.f32.mxu1 %vm968_vm0, %v969_v1  ;;  %v688_v7 = vpack.c.bf16 %v273_v6, %v272_v4  ;;  %v275_v9 = vld [vmem:[#allocation5 + $0x28] sm:$0xff]  ;;  %v364_v10 = vld [vmem:[#allocation7] sm:$0xff]  ;;  %v366_v12 = vld [vmem:[#allocation7 + $0x10] sm:$0xff]  ;;  %s473_s7 = sshll.u32 %s268_s28, 4  ;;  %s1215_s15 = scalar_lea.hbm %s1264_s5, %s577_s11  ;;  %s1217_s7 = int_to_ptr.vmem [resolvable:$true] %s473_s7 }
  0x6c   : > { %686 = vmatpush3.bf16.msra.mxu0 %v685_v5  ;;  %v365_v11 = vld [vmem:[#allocation7 + $0x8] sm:$0xff]  ;;  %v367_v13 = vld [vmem:[#allocation7 + $0x18] sm:$0xff]  ;;  %v691_v14 = vpack.c.bf16 %v275_v9, %v274_v8  ;;  %v276_v16 = vld [vmem:[#allocation5 + $0x30] sm:$0xff]  ;;  %s460_s16 = scalar_lea.sflag [#allocation4], %s1170_s12  ;;  %s890_s9 = scalar_lea.vmem %s1217_s7, 128 }
  0x6d   : > { %687 = vmatprep.subr.bf16.mxu0 %v967_v0  ;;  %v709_v15 = vpack.c.bf16 %v365_v11, %v364_v10  ;;  %v277_v17 = vld [vmem:[#allocation5 + $0x38] sm:$0xff]  ;;  %v712_v18 = vpack.c.bf16 %v367_v13, %v366_v12  ;;  %v368_v19 = vld [vmem:[#allocation7 + $0x20] sm:$0xff]  ;;  %v369_v20 = vld [vmem:[#allocation7 + $0x28] sm:$0xff]  ;;  %p891_p11 = scmp.ne.s32.totalorder %s1217_s7, %s890_s9  ;;  %p1278_p0 = scmp.ne.s32.totalorder %s1273_s23, 0 }
  0x6e   : > { %v694_v21 = vpack.c.bf16 %v277_v17, %v276_v16  ;;  %v278_v22 = vld [vmem:[#allocation5 + $0x40] sm:$0xff]  ;;  %v279_v23 = vld [vmem:[#allocation5 + $0x48] sm:$0xff]  ;;  %v715_v24 = vpack.c.bf16 %v369_v20, %v368_v19  ;;  %v370_v25 = vld [vmem:[#allocation7 + $0x30] sm:$0xff]  ;;  %s970_s22 = smov [#allocation8]  }
  0x6f   : > { %710 = vmatpush3.bf16.msra.mxu1 %v709_v15  ;;  %v371_v26 = vld [vmem:[#allocation7 + $0x38] sm:$0xff]  ;;  %v697_v27 = vpack.c.bf16 %v279_v23, %v278_v22  ;;  %v280_v28 = vld [vmem:[#allocation5 + $0x50] sm:$0xff]  ;;  %v372_v31 = vld [vmem:[#allocation7 + $0x40] sm:$0xff]  ;;  %p892_p1 = pnand %p891_p11, %p1278_p0  ;;  %s894_s13 = sshll.u32 %s970_s22, 4  ;;  %s895_s13 = int_to_ptr.vmem [resolvable:$false] %s894_s13 }
  0x70   : > { %689 = vmatpush3.bf16.msra.mxu0 %v688_v7  ;;  %711 = vmatprep.subr.bf16.mxu1 %v967_v0  ;;  %v281_v29 = vld [vmem:[#allocation5 + $0x58] sm:$0xff]  ;;  %v718_v30 = vpack.c.bf16 %v371_v26, %v370_v25  ;;  %v373_v32 = vld [vmem:[#allocation7 + $0x48] sm:$0xff]  ;;  %v282_v34 = vld [vmem:[#allocation5 + $0x60] sm:$0xff]  ;;  %s896_s29 = scalar_lea.vmem %s895_s13, 256  ;;  %p897_p7 = scmp.lt.s32.totalorder %s1217_s7, %s895_s13 }
  0x71   : > { %690 = vmatprep.subr.bf16.mxu0 %v967_v0  ;;  %v700_v33 = vpack.c.bf16 %v281_v29, %v280_v28  ;;  %v283_v35 = vld [vmem:[#allocation5 + $0x68] sm:$0xff]  ;;  %v721_v36 = vpack.c.bf16 %v373_v32, %v372_v31  ;;  %v374_v37 = vld [vmem:[#allocation7 + $0x50] sm:$0xff]  ;;  %v375_v38 = vld [vmem:[#allocation7 + $0x58] sm:$0xff]  ;;  %p893_p3 = pneg %p892_p1  ;;  %p898_p9 = scmp.lt.s32.totalorder %s896_s29, %s890_s9 }
  0x72   : > { %v703_v39 = vpack.c.bf16 %v283_v35, %v282_v34  ;;  %v284_v40 = vld [vmem:[#allocation5 + $0x70] sm:$0xff]  ;;  %v285_v41 = vld [vmem:[#allocation5 + $0x78] sm:$0xff]  ;;  %v724_v42 = vpack.c.bf16 %v375_v38, %v374_v37  ;;  %v376_v43 = vld [vmem:[#allocation7 + $0x60] sm:$0xff] }
  0x73   : > { %713 = vmatpush3.bf16.msra.mxu1 %v712_v18  ;;  %v377_v44 = vld [vmem:[#allocation7 + $0x68] sm:$0xff]  ;;  %v706_v45 = vpack.c.bf16 %v285_v41, %v284_v40  ;;  %v269_v47 = vld [vmem:[%s1176_s17] sm:$0xff]  ;;  %p899_p12 = por %p898_p9, %p897_p7 }
  0x74   : > { %692 = vmatpush3.bf16.msra.mxu0 %v691_v14  ;;  %714 = vmatprep.subr.bf16.mxu1 %v967_v0  ;;  %v727_v46 = vpack.c.bf16 %v377_v44, %v376_v43  ;;  %v378_v48 = vld [vmem:[#allocation7 + $0x70] sm:$0xff]  ;;  %v379_v49 = vld [vmem:[#allocation7 + $0x78] sm:$0xff] }
  0x75   : > { %693 = vmatprep.subr.bf16.mxu0 %v967_v0  ;;  %v730_v50 = vpack.c.bf16 %v379_v49, %v378_v48  ;;  %v574_v51 = vld [vmem:[%s1261_s2] ss:$0 sm:$0xff]  ;;  %p900_p2 = pnand %p899_p12, %p893_p3 }
  0x76   : > { %v575_v56 = vld [vmem:[%s1263_s4] ss:$0 sm:$0xff] }
  0x77   : > { %716 = vmatpush3.bf16.msra.mxu1 %v715_v24 }
  0x78   : > { %695 = vmatpush3.bf16.msra.mxu0 %v694_v21  ;;  %717 = vmatprep.subr.bf16.mxu1 %v967_v0 }
  0x79   : > { %696 = vmatprep.subr.bf16.mxu0 %v967_v0 }
  0x7b   : > { %719 = vmatpush3.bf16.msra.mxu1 %v718_v30 }
  0x7c   : > { %698 = vmatpush3.bf16.msra.mxu0 %v697_v27  ;;  %720 = vmatprep.subr.bf16.mxu1 %v967_v0 }
  0x7d   : > { %699 = vmatprep.subr.bf16.mxu0 %v967_v0 }
  0x7f   : > { %722 = vmatpush3.bf16.msra.mxu1 %v721_v36 }
  0x80   : > { %701 = vmatpush3.bf16.msra.mxu0 %v700_v33  ;;  %723 = vmatprep.subr.bf16.mxu1 %v967_v0 }
  0x81   : > { %702 = vmatprep.subr.bf16.mxu0 %v967_v0 }
  0x83   : > { %725 = vmatpush3.bf16.msra.mxu1 %v724_v42 }
  0x84   : > { %704 = vmatpush3.bf16.msra.mxu0 %v703_v39  ;;  %726 = vmatprep.subr.bf16.mxu1 %v967_v0 }
  0x85   : > { %705 = vmatprep.subr.bf16.mxu0 %v967_v0 }
  0x87   : > { %728 = vmatpush3.bf16.msra.mxu1 %v727_v46 }
  0x88   : > { %707 = vmatpush3.bf16.msra.mxu0 %v706_v45  ;;  %729 = vmatprep.subr.bf16.mxu1 %v967_v0 }
  0x8b   : > { %647 = vmatmul.mubr.f32.vlgmr.msra.gmra.mrb[0].mxu0 %v269_v47  ;;  %731 = vmatpush3.bf16.msra.mxu1 %v730_v50 }
 0x15e   : > { %v359_v52 = vpop.f32.mrb[0].mxu0 }
 0x15f   : > { %v360_v53 = vadd.f32 %v574_v51, %v359_v52  ;;  %v648_v54 = vpop.f32.mrb[1].mxu0 }
 0x161   : > { %v363_v55 = vmax.f32 %v360_v53, 0.0 }
 0x163   : > { %682 = vmatmul.mubr.f32.vlgmr.msra.gmra.mrb[0].mxu1 %v363_v55 }
 0x236   : > { %v453_v57 = vpop.f32.mrb[0].mxu1 }
 0x237   : > { %v454_v58 = vadd.f32 %v575_v56, %v453_v57  ;;  %v683_v59 = vpop.f32.mrb[1].mxu1 }
 0x239   : > { %v457_v60 = vmax.f32 %v454_v58, 0.0 }
 0x23b   : > { %458 = vst [vmem:[%s268_s28] sm:$0xff] %v457_v60 }
 0x23c   : > { %903 = shalt.err (!%p900_p2)
}
 0x23d   : > { %s904_s12 = scalar_lea.hbm %s1215_s15, 128  ;;  %s908_s26 = scalar_lea.hbm %s1264_s5, 256 }
 0x23e   : > { %p905_p13 = scmp.ne.s32.totalorder %s1215_s15, %s904_s12  ;;  %p909_p4 = scmp.lt.u32.totalorder %s1215_s15, %s1264_s5 }
 0x23f   : > { %p910_p5 = scmp.lt.u32.totalorder %s908_s26, %s904_s12  ;;  %p912_p11 = scmp.lt.u32.totalorder %s904_s12, %s1215_s15 }
 0x240   : > { %p906_p6 = pnand %p905_p13, %p1278_p0 }
 0x241   : > { %p911_p8 = por %p910_p5, %p909_p4 }
 0x242   : > { %p907_p10 = pneg %p906_p6 }
 0x243   : > { %p913_p1 = por %p912_p11, %p911_p8 }
 0x245   : > { %p914_p3 = pnand %p913_p1, %p907_p10 }
 0x247   : > { %917 = shalt.err (!%p914_p3)
}
 0x248   : > { %742 = dma.vmem_to_hbm [thread:$0]  (%p1278_p0), %s1217_s7, 128, %s1215_s15, %s460_s16  }
 0x249 PF: > { %s485_s11 = sand.u32 1, %s948_s18   ;;  %p1279_p7 = scmp.ne.s32.totalorder %s1269_s25, 0 }
 0x24a   : > { %p1280_p9 = scmp.ge.s32.totalorder %s960_s21, 2  ;;  %s486_s28 = scalar_lea.sflag [#allocation4], %s485_s11 }
 0x24c   : > { %p756_p12 = pnand %p1280_p9, %p1279_p7 }
 0x24e   : > { %943 = dma.done.wait (!%p756_p12), %s486_s28, 128  }
 0x24f   : > { %945 = vsyncadd (!%p756_p12), %s486_s28, 4294967168  ;;  %p19_p2 = scmp.ge.s32.totalorder %s1111_s14, 4   ;;  %s1281_s18 = smov %s952_s19 }
 0x250   : > { %s1282_s19 = smov %s956_s20  ;;  %s1283_s20 = smov %s1127_s27 }
 0x251   : > { %s1284_s21 = smov %s1111_s14  ;;  %21 = sbr.rel (!%p19_p2) target bundleno = 6 (0x6), region = 93 }
 0x258   :  { %491 = vsyncpa [#allocation3], 1 }
 0x259   :  { %493 = vsyncpa [#allocation3 + $0x1], 1 }
 0x25a   :  { %494 = vsyncpa [#allocation6], 1 }
 0x25b   :  { %495 = vsyncpa [#allocation4], 1 }
 0x25c   :  { %497 = vsyncpa [#allocation4 + $0x1], 1 }

// kernel: tpu_custom_call.1
= control target key start
LH: loop header
LB: loop body
LE: loop exit
PB: predicated region body
PF: predicated region fallthrough
CT: control target
= control target key end

     0   :  { %10 = vsyncpa [#allocation3], 0  ;;  %s1259_s0 = inlined_call_operand.hbm [shape: f32[16,128], index: 0, kind: input, shape index: {}]   ;;  %s1260_s1 = inlined_call_operand.hbm [shape: f32[128,128], index: 1, kind: input, shape index: {}]   ;;  %s1261_s2 = inlined_call_operand.vmem [shape: f32[1,128], index: 2, kind: input, shape index: {}]   ;;  %s1262_s3 = inlined_call_operand.hbm [shape: f32[128,128], index: 3, kind: input, shape index: {}]   ;;  %s1263_s4 = inlined_call_operand.vmem [shape: f32[1,128], index: 4, kind: input, shape index: {}]   ;;  %s1264_s5 = inlined_call_operand.hbm [shape: f32[16,128], index: 5, kind: output, shape index: {}]  }
   0x1   :  { %12 = vsyncpa [#allocation3 + $0x1], 0 }
   0x2   :  { %13 = vsyncpa [#allocation6], 0 }
   0x3   :  { %14 = vsyncpa [#allocation4], 0 }
   0x4   :  { %16 = vsyncpa [#allocation4 + $0x1], 0  ;;  %s1001_s18 = smov 0   ;;  %s1003_s19 = smov 0  }
   0x5   :  { %s1005_s20 = smov 0   ;;  %s1007_s21 = smov 0  }
   0x6 LB: > { %s1022_s22 = sadd.s32 4294967295, %s960_s21   ;;  %s562_s23 = sadd.s32 4294967294, %s960_s21   ;;  %s960_s21 = sphi %s1007_s21, %s1284_s21   ;;  %s956_s20 = sphi %s1005_s20, %s1283_s20   ;;  %s952_s19 = sphi %s1003_s19, %s1282_s19   ;;  %s948_s18 = sphi %s1001_s18, %s1281_s18  }
   0x7   : > { %p42_p0 = scmp.ne.s32.totalorder %s952_s19, %s948_s18  ;;  %p1265_p1 = scmp.eq.s32.totalorder %s1022_s22, 0 }
   0x8   : > { %p156_p3 = scmp.eq.s32.totalorder %s562_s23, 1  ;;  %p563_p5 = scmp.ge.s32.totalorder %s960_s21, 1 }
   0x9   : > { %p1031_p4 = por %p1265_p1, %p42_p0  ;;  %p163_p7 = scmp.lt.s32.totalorder %s960_s21, 3 }
   0xa   : > { %p1036_p6 = por %p156_p3, %p42_p0  ;;  %s962_s27 = smov [#allocation5]  }
   0xb   : > { %s1268_s24 = scalar_select %p1031_p4, 1, 0 }
   0xc   : > { %s1269_s25 = scalar_select %p1036_p6, 1, 0 }
   0xd   : > { %p1041_p8 = pnand %p563_p5, %p163_p7  ;;  %s175_s28 = sshll.u32 %s962_s27, 4  ;;  %s1045_s28 = int_to_ptr.vmem [resolvable:$true] %s175_s28 }
   0xe   : > { %s963_s30 = smov [#allocation7]   ;;  %s804_s9 = scalar_lea.hbm %s1260_s1, 2048 }
   0xf   : > { %p744_p9 = pneg %p1041_p8  ;;  %s191_s6 = sshll.u32 %s963_s30, 4  ;;  %s1056_s6 = int_to_ptr.vmem [resolvable:$true] %s191_s6 }
  0x10   : > { %p805_p12 = scmp.ne.s32.totalorder %s1260_s1, %s804_s9  ;;  %p811_p5 = scmp.lt.u32.totalorder %s804_s9, %s1260_s1 }
  0x11   : > { %p1052_p11 = pnand %p744_p9, %p1265_p1 }
  0x13   : > { %p806_p13 = pneg %p1052_p11 }
  0x15   : > { %p807_p0 = pnand %p806_p13, %p805_p12 }
  0x17   : > { %p808_p3 = pneg %p807_p0 }
  0x19   : > { %p813_p7 = pnand %p811_p5, %p808_p3 }
  0x1b   : > { %816 = shalt.err (!%p813_p7)
}
  0x1c   : > { %s817_s14 = scalar_lea.vmem %s1045_s28, 2048  ;;  %p825_p2 = scmp.lt.s32.totalorder %s1045_s28, %s1045_s28 }
  0x1d   : > { %p818_p9 = scmp.ne.s32.totalorder %s1045_s28, %s817_s14  ;;  %p826_p12 = scmp.lt.s32.totalorder %s817_s14, %s817_s14 }
  0x1f   : > { %p820_p10 = pnand %p818_p9, %p806_p13  ;;  %p827_p0 = por %p826_p12, %p825_p2 }
  0x21   : > { %p821_p1 = pneg %p820_p10 }
  0x23   : > { %p828_p6 = pnand %p827_p0, %p821_p1 }
  0x25   : > { %831 = shalt.err (!%p828_p6)
}
  0x26   : > { %s964_s15 = smov 128   ;;  %s965_s16 = smov 8  }
  0x27   : > { %747 = dma.hbm_to_vmem [thread:$0]  (!%p1052_p11), %s1260_s1, 2048, %s1045_s28, [#allocation6], %s964_s15, %s964_s15, %s965_s16  }
  0x28   : > { %s832_s7 = scalar_lea.hbm %s1262_s3, 2048 }
  0x29   : > { %p833_p2 = scmp.ne.s32.totalorder %s1262_s3, %s832_s7  ;;  %p839_p10 = scmp.lt.u32.totalorder %s832_s7, %s1262_s3 }
  0x2b   : > { %p835_p1 = pnand %p833_p2, %p806_p13 }
  0x2d   : > { %p836_p6 = pneg %p835_p1 }
  0x2f   : > { %p841_p3 = pnand %p839_p10, %p836_p6 }
  0x31   : > { %844 = shalt.err (!%p841_p3)
}
  0x32   : > { %s845_s28 = scalar_lea.vmem %s1056_s6, 2048  ;;  %p853_p12 = scmp.lt.s32.totalorder %s1056_s6, %s1056_s6 }
  0x33   : > { %p846_p5 = scmp.ne.s32.totalorder %s1056_s6, %s845_s28  ;;  %p854_p0 = scmp.lt.s32.totalorder %s845_s28, %s845_s28 }
  0x35   : > { %p848_p7 = pnand %p846_p5, %p806_p13  ;;  %p855_p2 = por %p854_p0, %p853_p12 }
  0x37   : > { %p849_p9 = pneg %p848_p7 }
  0x39   : > { %p856_p1 = pnand %p855_p2, %p849_p9 }
  0x3b   : > { %859 = shalt.err (!%p856_p1)
}
  0x3c   : > { %750 = dma.hbm_to_vmem [thread:$0]  (!%p1052_p11), %s1262_s3, 2048, %s1056_s6, [#allocation6], %s964_s15, %s964_s15, %s965_s16  }
  0x3d   : > { %s1111_s14 = sadd.s32 1, %s960_s21   ;;  %s29_s29 = sadd.s32 1, %s956_s20 }
  0x3e   : > { %s26_s17 = ssub.s32 %s960_s21, %s1111_s14  ;;  %p36_p13 = scmp.ne.s32.totalorder %s956_s20, %s952_s19 }
  0x3f   : > { %p27_p6 = scmp.eq.s32.totalorder %s26_s17, 0  ;;  %p37_p10 = scmp.eq.s32.totalorder %s960_s21, 0 }
  0x40   : > { %p1272_p3 = scmp.eq.s32.totalorder %s1022_s22, 1  ;;  %p761_p7 = scmp.lt.s32.totalorder %s960_s21, 2 }
  0x41   : > { %s1127_s27 = scalar_select %p27_p6, %s956_s20, %s29_s29  }
  0x42   : > { %p1121_p5 = por %p1272_p3, %p36_p13  ;;  %p38_p9 = por %p37_p10, %p36_p13 }
  0x43   : > { %s208_s30 = sand.u32 1, %s956_s20   ;;  %s568_s6 = sshll.u32 %s960_s21, 7 }
  0x44   : > { %s1273_s23 = scalar_select %p1121_p5, 1, 0 }
  0x45   : > { %s567_s7 = sshll.u32 %s208_s30, 3  ;;  %s1134_s8 = scalar_lea.hbm %s1259_s0, %s568_s6 }
  0x46   : > { %s212_s9 = scalar_lea.vmem [#allocation2], %s567_s7  ;;  %p1138_p11 = pnand %p761_p7, %p38_p9 }
  0x47   : > { %s219_s10 = sshll.u32 %s212_s9, 4  ;;  %s209_s28 = scalar_lea.sflag [#allocation3], %s208_s30  ;;  %s1136_s10 = int_to_ptr.vmem [resolvable:$true] %s219_s10 }
  0x48   : > { %s860_s12 = scalar_lea.hbm %s1134_s8, 128  ;;  %p862_p0 = pneg %p1138_p11 }
  0x49   : > { %p861_p12 = scmp.ne.s32.totalorder %s1134_s8, %s860_s12  ;;  %s865_s17 = scalar_lea.hbm %s1259_s0, 256 }
  0x4a   : > { %p866_p13 = scmp.lt.u32.totalorder %s1134_s8, %s1259_s0  ;;  %p867_p6 = scmp.lt.u32.totalorder %s865_s17, %s860_s12 }
  0x4b   : > { %p863_p2 = pnand %p862_p0, %p861_p12  ;;  %p869_p3 = scmp.lt.u32.totalorder %s860_s12, %s1134_s8 }
  0x4c   : > { %p868_p10 = por %p867_p6, %p866_p13 }
  0x4d   : > { %p864_p1 = pneg %p863_p2 }
  0x4e   : > { %p870_p7 = por %p869_p3, %p868_p10 }
  0x50   : > { %p871_p9 = pnand %p870_p7, %p864_p1 }
  0x52   : > { %874 = shalt.err (!%p871_p9)
}
  0x53   : > { %s875_s30 = scalar_lea.vmem %s1136_s10, 128  ;;  %s966_s15 = smov [#allocation2]  }
  0x54   : > { %p876_p12 = scmp.ne.s32.totalorder %s1136_s10, %s875_s30  ;;  %s880_s16 = sshll.u32 %s966_s15, 4  ;;  %s881_s16 = int_to_ptr.vmem [resolvable:$false] %s880_s16 }
  0x55   : > { %s882_s9 = scalar_lea.vmem %s881_s16, 256  ;;  %p883_p4 = scmp.lt.s32.totalorder %s1136_s10, %s881_s16 }
  0x56   : > { %p878_p2 = pnand %p876_p12, %p862_p0  ;;  %p884_p13 = scmp.lt.s32.totalorder %s882_s9, %s875_s30 }
  0x58   : > { %p879_p5 = pneg %p878_p2  ;;  %p885_p6 = por %p884_p13, %p883_p4 }
  0x5a   : > { %p886_p10 = pnand %p885_p6, %p879_p5 }
  0x5c   : > { %889 = shalt.err (!%p886_p10)
}
  0x5d   : > { %754 = dma.hbm_to_vmem [thread:$0]  (!%p1138_p11), %s1134_s8, 128, %s1136_s10, %s209_s28  }
  0x5e   : > { %228 = sbr.rel (%p1041_p8) target bundleno = 585 (0x249), region = 40  ;;  %s1170_s12 = sand.u32 (!%p1041_p8), 1, %s952_s19  }
  0x5f   : > { %s570_s13 = sshll.u32 (!%p1041_p8), %s1170_s12, 3  ;;  %s231_s29 = scalar_lea.sflag (!%p1041_p8), [#allocation3], %s1170_s12 }
  0x60   : > { %s1176_s17 = scalar_lea.vmem (!%p1041_p8), [#allocation2], %s570_s13  ;;  %p1275_p4 = scmp.ne.s32.totalorder (!%p1041_p8), %s1268_s24, 0 }
  0x65   : > { %935 = dma.done.wait (%p1275_p4), %s231_s29, 128  }
  0x66   : > { %937 = vsyncadd (%p1275_p4), %s231_s29, 4294967168  ;;  %p1276_p5 = scmp.eq.s32.totalorder %s1022_s22, 0 }
  0x68   : > { %939 = dma.done.wait (%p1276_p5), [#allocation6], 4096   ;;  %p1277_p8 = pmov %p1276_p5 }
  0x69   : > { %v967_v0 = vmov 0.0|0.0   ;;  %vm968_vm0 = vmmov 0   ;;  %v969_v1 = vmov 0.0   ;;  %v270_v2 = vld [vmem:[#allocation5] sm:$0xff]  ;;  %v271_v3 = vld [vmem:[#allocation5 + $0x8] sm:$0xff]  ;;  %v272_v4 = vld [vmem:[#allocation5 + $0x10] sm:$0xff] }
  0x6a   : > { %941 = vsyncadd (%p1277_p8), [#allocation6], 4294963200  ;;  %684 = vmatprep.subr.bf16.mxu0 %v967_v0  ;;  %646 = vmatprep.mubr.msk.f32.mxu0 %vm968_vm0, %v969_v1  ;;  %v685_v5 = vpack.c.bf16 %v271_v3, %v270_v2  ;;  %v273_v6 = vld [vmem:[#allocation5 + $0x18] sm:$0xff]  ;;  %v274_v8 = vld [vmem:[#allocation5 + $0x20] sm:$0xff]  ;;  %s577_s11 = sshll.u32 %s1022_s22, 7  ;;  %s268_s28 = scalar_lea.vmem [#allocation8], %s570_s13 }
  0x6b   : > { %708 = vmatprep.subr.bf16.mxu1 %v967_v0  ;;  %681 = vmatprep.mubr.msk.f32.mxu1 %vm968_vm0, %v969_v1  ;;  %v688_v7 = vpack.c.bf16 %v273_v6, %v272_v4  ;;  %v275_v9 = vld [vmem:[#allocation5 + $0x28] sm:$0xff]  ;;  %v364_v10 = vld [vmem:[#allocation7] sm:$0xff]  ;;  %v366_v12 = vld [vmem:[#allocation7 + $0x10] sm:$0xff]  ;;  %s473_s7 = sshll.u32 %s268_s28, 4  ;;  %s1215_s15 = scalar_lea.hbm %s1264_s5, %s577_s11  ;;  %s1217_s7 = int_to_ptr.vmem [resolvable:$true] %s473_s7 }
  0x6c   : > { %686 = vmatpush3.bf16.msra.mxu0 %v685_v5  ;;  %v365_v11 = vld [vmem:[#allocation7 + $0x8] sm:$0xff]  ;;  %v367_v13 = vld [vmem:[#allocation7 + $0x18] sm:$0xff]  ;;  %v691_v14 = vpack.c.bf16 %v275_v9, %v274_v8  ;;  %v276_v16 = vld [vmem:[#allocation5 + $0x30] sm:$0xff]  ;;  %s460_s16 = scalar_lea.sflag [#allocation4], %s1170_s12  ;;  %s890_s9 = scalar_lea.vmem %s1217_s7, 128 }
  0x6d   : > { %687 = vmatprep.subr.bf16.mxu0 %v967_v0  ;;  %v709_v15 = vpack.c.bf16 %v365_v11, %v364_v10  ;;  %v277_v17 = vld [vmem:[#allocation5 + $0x38] sm:$0xff]  ;;  %v712_v18 = vpack.c.bf16 %v367_v13, %v366_v12  ;;  %v368_v19 = vld [vmem:[#allocation7 + $0x20] sm:$0xff]  ;;  %v369_v20 = vld [vmem:[#allocation7 + $0x28] sm:$0xff]  ;;  %p891_p11 = scmp.ne.s32.totalorder %s1217_s7, %s890_s9  ;;  %p1278_p0 = scmp.ne.s32.totalorder %s1273_s23, 0 }
  0x6e   : > { %v694_v21 = vpack.c.bf16 %v277_v17, %v276_v16  ;;  %v278_v22 = vld [vmem:[#allocation5 + $0x40] sm:$0xff]  ;;  %v279_v23 = vld [vmem:[#allocation5 + $0x48] sm:$0xff]  ;;  %v715_v24 = vpack.c.bf16 %v369_v20, %v368_v19  ;;  %v370_v25 = vld [vmem:[#allocation7 + $0x30] sm:$0xff]  ;;  %s970_s22 = smov [#allocation8]  }
  0x6f   : > { %710 = vmatpush3.bf16.msra.mxu1 %v709_v15  ;;  %v371_v26 = vld [vmem:[#allocation7 + $0x38] sm:$0xff]  ;;  %v697_v27 = vpack.c.bf16 %v279_v23, %v278_v22  ;;  %v280_v28 = vld [vmem:[#allocation5 + $0x50] sm:$0xff]  ;;  %v372_v31 = vld [vmem:[#allocation7 + $0x40] sm:$0xff]  ;;  %p892_p1 = pnand %p891_p11, %p1278_p0  ;;  %s894_s13 = sshll.u32 %s970_s22, 4  ;;  %s895_s13 = int_to_ptr.vmem [resolvable:$false] %s894_s13 }
  0x70   : > { %689 = vmatpush3.bf16.msra.mxu0 %v688_v7  ;;  %711 = vmatprep.subr.bf16.mxu1 %v967_v0  ;;  %v281_v29 = vld [vmem:[#allocation5 + $0x58] sm:$0xff]  ;;  %v718_v30 = vpack.c.bf16 %v371_v26, %v370_v25  ;;  %v373_v32 = vld [vmem:[#allocation7 + $0x48] sm:$0xff]  ;;  %v282_v34 = vld [vmem:[#allocation5 + $0x60] sm:$0xff]  ;;  %s896_s29 = scalar_lea.vmem %s895_s13, 256  ;;  %p897_p7 = scmp.lt.s32.totalorder %s1217_s7, %s895_s13 }
  0x71   : > { %690 = vmatprep.subr.bf16.mxu0 %v967_v0  ;;  %v700_v33 = vpack.c.bf16 %v281_v29, %v280_v28  ;;  %v283_v35 = vld [vmem:[#allocation5 + $0x68] sm:$0xff]  ;;  %v721_v36 = vpack.c.bf16 %v373_v32, %v372_v31  ;;  %v374_v37 = vld [vmem:[#allocation7 + $0x50] sm:$0xff]  ;;  %v375_v38 = vld [vmem:[#allocation7 + $0x58] sm:$0xff]  ;;  %p893_p3 = pneg %p892_p1  ;;  %p898_p9 = scmp.lt.s32.totalorder %s896_s29, %s890_s9 }
  0x72   : > { %v703_v39 = vpack.c.bf16 %v283_v35, %v282_v34  ;;  %v284_v40 = vld [vmem:[#allocation5 + $0x70] sm:$0xff]  ;;  %v285_v41 = vld [vmem:[#allocation5 + $0x78] sm:$0xff]  ;;  %v724_v42 = vpack.c.bf16 %v375_v38, %v374_v37  ;;  %v376_v43 = vld [vmem:[#allocation7 + $0x60] sm:$0xff] }
  0x73   : > { %713 = vmatpush3.bf16.msra.mxu1 %v712_v18  ;;  %v377_v44 = vld [vmem:[#allocation7 + $0x68] sm:$0xff]  ;;  %v706_v45 = vpack.c.bf16 %v285_v41, %v284_v40  ;;  %v269_v47 = vld [vmem:[%s1176_s17] sm:$0xff]  ;;  %p899_p12 = por %p898_p9, %p897_p7 }
  0x74   : > { %692 = vmatpush3.bf16.msra.mxu0 %v691_v14  ;;  %714 = vmatprep.subr.bf16.mxu1 %v967_v0  ;;  %v727_v46 = vpack.c.bf16 %v377_v44, %v376_v43  ;;  %v378_v48 = vld [vmem:[#allocation7 + $0x70] sm:$0xff]  ;;  %v379_v49 = vld [vmem:[#allocation7 + $0x78] sm:$0xff] }
  0x75   : > { %693 = vmatprep.subr.bf16.mxu0 %v967_v0  ;;  %v730_v50 = vpack.c.bf16 %v379_v49, %v378_v48  ;;  %v574_v51 = vld [vmem:[%s1261_s2] ss:$0 sm:$0xff]  ;;  %p900_p2 = pnand %p899_p12, %p893_p3 }
  0x76   : > { %v575_v56 = vld [vmem:[%s1263_s4] ss:$0 sm:$0xff] }
  0x77   : > { %716 = vmatpush3.bf16.msra.mxu1 %v715_v24 }
  0x78   : > { %695 = vmatpush3.bf16.msra.mxu0 %v694_v21  ;;  %717 = vmatprep.subr.bf16.mxu1 %v967_v0 }
  0x79   : > { %696 = vmatprep.subr.bf16.mxu0 %v967_v0 }
  0x7b   : > { %719 = vmatpush3.bf16.msra.mxu1 %v718_v30 }
  0x7c   : > { %698 = vmatpush3.bf16.msra.mxu0 %v697_v27  ;;  %720 = vmatprep.subr.bf16.mxu1 %v967_v0 }
  0x7d   : > { %699 = vmatprep.subr.bf16.mxu0 %v967_v0 }
  0x7f   : > { %722 = vmatpush3.bf16.msra.mxu1 %v721_v36 }
  0x80   : > { %701 = vmatpush3.bf16.msra.mxu0 %v700_v33  ;;  %723 = vmatprep.subr.bf16.mxu1 %v967_v0 }
  0x81   : > { %702 = vmatprep.subr.bf16.mxu0 %v967_v0 }
  0x83   : > { %725 = vmatpush3.bf16.msra.mxu1 %v724_v42 }
  0x84   : > { %704 = vmatpush3.bf16.msra.mxu0 %v703_v39  ;;  %726 = vmatprep.subr.bf16.mxu1 %v967_v0 }
  0x85   : > { %705 = vmatprep.subr.bf16.mxu0 %v967_v0 }
  0x87   : > { %728 = vmatpush3.bf16.msra.mxu1 %v727_v46 }
  0x88   : > { %707 = vmatpush3.bf16.msra.mxu0 %v706_v45  ;;  %729 = vmatprep.subr.bf16.mxu1 %v967_v0 }
  0x8b   : > { %647 = vmatmul.mubr.f32.vlgmr.msra.gmra.mrb[0].mxu0 %v269_v47  ;;  %731 = vmatpush3.bf16.msra.mxu1 %v730_v50 }
 0x15e   : > { %v359_v52 = vpop.f32.mrb[0].mxu0 }
 0x15f   : > { %v360_v53 = vadd.f32 %v574_v51, %v359_v52  ;;  %v648_v54 = vpop.f32.mrb[1].mxu0 }
 0x161   : > { %v363_v55 = vmax.f32 %v360_v53, 0.0 }
 0x163   : > { %682 = vmatmul.mubr.f32.vlgmr.msra.gmra.mrb[0].mxu1 %v363_v55 }
 0x236   : > { %v453_v57 = vpop.f32.mrb[0].mxu1 }
 0x237   : > { %v454_v58 = vadd.f32 %v575_v56, %v453_v57  ;;  %v683_v59 = vpop.f32.mrb[1].mxu1 }
 0x239   : > { %v457_v60 = vmax.f32 %v454_v58, 0.0 }
 0x23b   : > { %458 = vst [vmem:[%s268_s28] sm:$0xff] %v457_v60 }
 0x23c   : > { %903 = shalt.err (!%p900_p2)
}
 0x23d   : > { %s904_s12 = scalar_lea.hbm %s1215_s15, 128  ;;  %s908_s26 = scalar_lea.hbm %s1264_s5, 256 }
 0x23e   : > { %p905_p13 = scmp.ne.s32.totalorder %s1215_s15, %s904_s12  ;;  %p909_p4 = scmp.lt.u32.totalorder %s1215_s15, %s1264_s5 }
 0x23f   : > { %p910_p5 = scmp.lt.u32.totalorder %s908_s26, %s904_s12  ;;  %p912_p11 = scmp.lt.u32.totalorder %s904_s12, %s1215_s15 }
 0x240   : > { %p906_p6 = pnand %p905_p13, %p1278_p0 }
 0x241   : > { %p911_p8 = por %p910_p5, %p909_p4 }
 0x242   : > { %p907_p10 = pneg %p906_p6 }
 0x243   : > { %p913_p1 = por %p912_p11, %p911_p8 }
 0x245   : > { %p914_p3 = pnand %p913_p1, %p907_p10 }
 0x247   : > { %917 = shalt.err (!%p914_p3)
}
 0x248   : > { %742 = dma.vmem_to_hbm [thread:$0]  (%p1278_p0), %s1217_s7, 128, %s1215_s15, %s460_s16  }
 0x249 PF: > { %s485_s11 = sand.u32 1, %s948_s18   ;;  %p1279_p7 = scmp.ne.s32.totalorder %s1269_s25, 0 }
 0x24a   : > { %p1280_p9 = scmp.ge.s32.totalorder %s960_s21, 2  ;;  %s486_s28 = scalar_lea.sflag [#allocation4], %s485_s11 }
 0x24c   : > { %p756_p12 = pnand %p1280_p9, %p1279_p7 }
 0x24e   : > { %943 = dma.done.wait (!%p756_p12), %s486_s28, 128  }
 0x24f   : > { %945 = vsyncadd (!%p756_p12), %s486_s28, 4294967168  ;;  %p19_p2 = scmp.ge.s32.totalorder %s1111_s14, 4   ;;  %s1281_s18 = smov %s952_s19 }
 0x250   : > { %s1282_s19 = smov %s956_s20  ;;  %s1283_s20 = smov %s1127_s27 }
 0x251   : > { %s1284_s21 = smov %s1111_s14  ;;  %21 = sbr.rel (!%p19_p2) target bundleno = 6 (0x6), region = 93 }
 0x258   :  { %491 = vsyncpa [#allocation3], 1 }
 0x259   :  { %493 = vsyncpa [#allocation3 + $0x1], 1 }
 0x25a   :  { %494 = vsyncpa [#allocation6], 1 }
 0x25b   :  { %495 = vsyncpa [#allocation4], 1 }
 0x25c   :  { %497 = vsyncpa [#allocation4 + $0x1], 1 }

</bundles_post_ra>
